<compile_context>
chip_gen: v7x
topology: tpu7x:2x2x1
jax: 0.10.0
libtpu: 0.0.40
codegen_flags: <defaults>
</compile_context>

<pallas_src>
import jax
import jax.numpy as jnp
from jax.experimental import pallas as pl
from jax.experimental.pallas import tpu as pltpu


_NUM_SPLITS = 2  # leading "parallel" grid axis (2 TCs on v7x; no-op elsewhere)


def _round_up(v, m):
    return ((v + m - 1) // m) * m


def _edge_sum_kernel(feat_ref, w1t_ref, b1_ref, out_ref):
    """Accumulate sum_e relu(W1^T feat_e + b1) over this split's edge tiles.

    feat_ref: [F_in, tile_e] bf16 (lane-dense edge features)
    w1t_ref : [H, F_in]      bf16
    b1_ref  : [H, 1]         f32
    out_ref : [1, H, 1]      f32  (resident across the reduction axis)
    """
    t = pl.program_id(1)

    @pl.when(t == 0)
    def _init():
        out_ref[...] = jnp.zeros_like(out_ref)

    h = jnp.dot(w1t_ref[...], feat_ref[...],
                preferred_element_type=jnp.float32)        # [H, tile_e] f32
    h = jnp.maximum(h + b1_ref[...], 0.0)
    out_ref[...] += jnp.sum(h, axis=1, keepdims=True).reshape(out_ref.shape)


@jax.jit
def critic_forward(params, x, edge_index, edge_attr):
    N, node_size = x.shape
    E = edge_index.shape[1]
    F_in = 2 * node_size + edge_attr.shape[1]
    H = params["w2"].shape[0]

    sum_x = jnp.sum(x, axis=0)                             # [node_size]
    b1_row = params["b1"][0]                               # [H] f32

    if E == 0:
        sum_h = jnp.zeros((H,), jnp.float32)
    else:
        # --- glue: lane-dense bf16 edge slab [F_in, E] (E on the lane axis) ---
        x_bf = x.astype(jnp.bfloat16)
        featT = jnp.concatenate(
            [x_bf[edge_index[0]], x_bf[edge_index[1]],
             edge_attr.astype(jnp.bfloat16)], axis=1).T    # [F_in, E]

        tile_e = min(4096, _round_up(E, 128))
        e_pad = _round_up(E, _NUM_SPLITS * tile_e)
        if e_pad != E:
            featT = jnp.pad(featT, ((0, 0), (0, e_pad - E)))
        tiles_per_split = e_pad // (_NUM_SPLITS * tile_e)

        w1t = params["w1"].T.astype(jnp.bfloat16)          # [H, F_in]
        b1_col = params["b1"].T                            # [H, 1] f32

        flops = 2 * e_pad * F_in * H
        bytes_accessed = 2 * e_pad * F_in + 2 * H * F_in + 4 * H + 4 * _NUM_SPLITS * H

        partial = pl.pallas_call(
            _edge_sum_kernel,
            out_shape=jax.ShapeDtypeStruct((_NUM_SPLITS, H, 1), jnp.float32),
            grid=(_NUM_SPLITS, tiles_per_split),
            in_specs=[
                pl.BlockSpec((F_in, tile_e),
                             lambda c, t: (0, c * tiles_per_split + t)),  # streamed
                pl.BlockSpec((H, F_in), lambda c, t: (0, 0)),             # w1^T
                pl.BlockSpec((H, 1), lambda c, t: (0, 0)),                # b1
            ],
            out_specs=pl.BlockSpec((1, H, 1), lambda c, t: (c, 0, 0)),
            compiler_params=pltpu.CompilerParams(
                dimension_semantics=("parallel", "arbitrary")),
            cost_estimate=pl.CostEstimate(flops=flops, transcendentals=0,
                                          bytes_accessed=bytes_accessed),
        )(featT, w1t, b1_col)

        # Sum per-core partials; remove the zero-padded edge columns' contribution
        # (each padded column contributes exactly relu(b1) in f32).
        acc = jnp.sum(partial, axis=(0, 2))                                # [H]
        sum_h = acc - jnp.float32(e_pad - E) * jnp.maximum(b1_row, 0.0)

    # Finalize in plain JAX (O(H^2 + H*C), negligible): second EdgeConv layer
    # commuted through the edge sum (its bias contributes E * b2), then value head.
    sum_msg = sum_h @ params["w2"] + jnp.float32(E) * params["b2"][0]      # [H]
    x_pp = jnp.concatenate([sum_x, sum_msg])                               # [node+H]
    v = x_pp @ params["wv"] + params["bv"][0]                              # [C]
    return v


def _reference_forward(params, x, edge_index, edge_attr):
    """Plain-JAX f32 reference mirroring the PyTorch Critic."""
    N = x.shape[0]
    x_i = x[edge_index[0]]
    x_j = x[edge_index[1]]
    tmp = jnp.concatenate([x_i, x_j, edge_attr], axis=1)
    h = jnp.maximum(tmp @ params["w1"] + params["b1"], 0.0)
    msg = h @ params["w2"] + params["b2"]
    agg = jnp.zeros((N, msg.shape[1]), msg.dtype).at[edge_index[0]].add(msg)
    x_pp = jnp.concatenate([x, agg], axis=1)
    x_pp = jnp.sum(x_pp, axis=0)
    return x_pp @ params["wv"] + params["bv"][0]


def _make_inputs(key, N, E, node_size, edge_size, hidden_dim, out_channels):
    keys = jax.random.split(key, 10)
    x = jax.random.normal(keys[0], (N, node_size), jnp.float32)
    src = jax.random.randint(keys[1], (E,), 0, N)
    dst = jax.random.randint(keys[2], (E,), 0, N)
    edge_index = jnp.stack([src, dst]).astype(jnp.int32)
    edge_attr = jax.random.normal(keys[3], (E, edge_size), jnp.float32)

    F_in = 2 * node_size + edge_size

    def init(k, shape, scale=0.1):
        return (scale * jax.random.normal(k, shape)).astype(jnp.float32)

    params = {
        "w1": init(keys[4], (F_in, hidden_dim)),
        "b1": init(keys[5], (1, hidden_dim)),
        "w2": init(keys[6], (hidden_dim, hidden_dim)),
        "b2": init(keys[7], (1, hidden_dim)),
        "wv": init(keys[8], (node_size + hidden_dim, out_channels)),
        "bv": init(keys[9], (1, out_channels)),
    }
    return params, x, edge_index, edge_attr


if __name__ == "__main__":
    # Critic constructor defaults
    node_size, edge_size, hidden_dim, out_channels = 4, 2, 32, 1

    # Case 1: small graph, single edge tile per split
    params, x, ei, ea = _make_inputs(jax.random.PRNGKey(0),
                                     N=8, E=16,
                                     node_size=node_size, edge_size=edge_size,
                                     hidden_dim=hidden_dim, out_channels=out_channels)
    v = critic_forward(params, x, ei, ea)
    jax.block_until_ready(v)
    v_ref = _reference_forward(params, x, ei, ea)
    assert v.shape == (out_channels,)
    assert jnp.allclose(v, v_ref, rtol=2e-2, atol=2e-2), (v, v_ref)

    # Case 2: larger graph, padded edge axis + two-way split
    params2, x2, ei2, ea2 = _make_inputs(jax.random.PRNGKey(1),
                                         N=50, E=1300,
                                         node_size=node_size, edge_size=edge_size,
                                         hidden_dim=hidden_dim, out_channels=out_channels)
    v2 = critic_forward(params2, x2, ei2, ea2)
    jax.block_until_ready(v2)
    v2_ref = _reference_forward(params2, x2, ei2, ea2)
    assert v2.shape == (out_channels,)
    assert jnp.allclose(v2, v2_ref, rtol=5e-2, atol=1e-1), (v2, v2_ref)

    # Case 3: degenerate no-edge graph (kernel skipped, pure finalize path)
    params3, x3, ei3, ea3 = _make_inputs(jax.random.PRNGKey(2),
                                         N=6, E=0,
                                         node_size=node_size, edge_size=edge_size,
                                         hidden_dim=hidden_dim, out_channels=out_channels)
    v3 = critic_forward(params3, x3, ei3, ea3)
    jax.block_until_ready(v3)
    v3_ref = _reference_forward(params3, x3, ei3, ea3)
    assert v3.shape == (out_channels,)
    assert jnp.allclose(v3, v3_ref, rtol=1e-4, atol=1e-4), (v3, v3_ref)

    print("KERNEL_OK")
</pallas_src>

<mosaic_0001>
module attributes {stable_mosaic.version = 11 : i64} {
  func.func @_edge_sum_kernel(%arg0: i32, %arg1: i32, %arg2: memref<10x128xbf16, #tpu.memory_space<vmem>>, %arg3: memref<32x10xbf16, #tpu.memory_space<vmem>>, %arg4: memref<32x1xf32, #tpu.memory_space<vmem>>, %arg5: memref<1x32x1xf32, #tpu.memory_space<vmem>>) attributes {dimension_semantics = [#tpu.dimension_semantics<parallel>, #tpu.dimension_semantics<arbitrary>], iteration_bounds = array<i64: 2, 1>, scalar_prefetch = 0 : i64, scratch_operands = 0 : i64, tpu.core_type = #tpu.core_type<tc>, window_params = [{transform_indices = @transform_0, window_bounds = array<i64: 10, 128>}, {pipeline_mode = #tpu.pipeline_mode<synchronous>, transform_indices = @transform_1, window_bounds = array<i64: 32, 10>}, {pipeline_mode = #tpu.pipeline_mode<synchronous>, transform_indices = @transform_2, window_bounds = array<i64: 32, 1>}, {transform_indices = @transform_3, window_bounds = array<i64: 1, 32, 1>}]} {
    %c0_i32 = arith.constant 0 : i32
    %0 = arith.cmpi eq, %arg1, %c0_i32 : i32
    %1 = arith.extui %0 : i1 to i32
    %c0_i32_0 = arith.constant 0 : i32
    %2 = arith.cmpi ne, %1, %c0_i32_0 : i32
    scf.if %2 {
      %cst_14 = arith.constant 0.000000e+00 : f32
      %17 = vector.broadcast %cst_14 : f32 to vector<1x32x1xf32>
      %c0_15 = arith.constant 0 : index
      %c0_16 = arith.constant 0 : index
      %c0_17 = arith.constant 0 : index
      %18 = vector.load %arg5[%c0_15, %c0_16, %c0_17] : memref<1x32x1xf32, #tpu.memory_space<vmem>>, vector<1x32x1xf32>
      tpu.vector_store %arg5[%c0_15, %c0_16, %c0_17], %17 {strides = array<i32>} : memref<1x32x1xf32, #tpu.memory_space<vmem>>, vector<1x32x1xf32>,
    } else {
    }
    %c0 = arith.constant 0 : index
    %c0_1 = arith.constant 0 : index
    %3 = vector.load %arg3[%c0, %c0_1] : memref<32x10xbf16, #tpu.memory_space<vmem>>, vector<32x10xbf16>
    %c0_2 = arith.constant 0 : index
    %c0_3 = arith.constant 0 : index
    %4 = vector.load %arg2[%c0_2, %c0_3] : memref<10x128xbf16, #tpu.memory_space<vmem>>, vector<10x128xbf16>
    %cst = arith.constant dense<0.000000e+00> : vector<32x128xf32>
    %5 = tpu.matmul %3, %4, %cst {dimension_numbers = #tpu.dot_dimension_numbers<[1], [0], [0], [1], [0, 0, 1, 1], [], []>} : vector<32x10xbf16>, vector<10x128xbf16>, vector<32x128xf32> -> vector<32x128xf32>
    %c0_4 = arith.constant 0 : index
    %c0_5 = arith.constant 0 : index
    %6 = vector.load %arg4[%c0_4, %c0_5] : memref<32x1xf32, #tpu.memory_space<vmem>>, vector<32x1xf32>
    %7 = vector.broadcast %6 : vector<32x1xf32> to vector<32x128xf32>
    %8 = arith.addf %5, %7 : vector<32x128xf32>
    %cst_6 = arith.constant 0.000000e+00 : f32
    %9 = vector.broadcast %cst_6 : f32 to vector<32x128xf32>
    %10 = arith.maximumf %8, %9 : vector<32x128xf32>
    %c0_7 = arith.constant 0 : index
    %c0_8 = arith.constant 0 : index
    %c0_9 = arith.constant 0 : index
    %11 = vector.load %arg5[%c0_7, %c0_8, %c0_9] : memref<1x32x1xf32, #tpu.memory_space<vmem>>, vector<1x32x1xf32>
    %cst_10 = arith.constant dense<0.000000e+00> : vector<32xf32>
    %12 = vector.multi_reduction <add>, %10, %cst_10 [1] : vector<32x128xf32> to vector<32xf32>
    %13 = vector.shape_cast %12 : vector<32xf32> to vector<32x1xf32>
    %14 = vector.shape_cast %13 : vector<32x1xf32> to vector<1x32x1xf32>
    %15 = arith.addf %11, %14 : vector<1x32x1xf32>
    %c0_11 = arith.constant 0 : index
    %c0_12 = arith.constant 0 : index
    %c0_13 = arith.constant 0 : index
    %16 = vector.load %arg5[%c0_11, %c0_12, %c0_13] : memref<1x32x1xf32, #tpu.memory_space<vmem>>, vector<1x32x1xf32>
    tpu.vector_store %arg5[%c0_11, %c0_12, %c0_13], %15 {strides = array<i32>} : memref<1x32x1xf32, #tpu.memory_space<vmem>>, vector<1x32x1xf32>,
    return
  }
  func.func @transform_0(%arg0: i32, %arg1: i32) -> (i32, i32) {
    %c1_i32 = arith.constant 1 : i32
    %0 = arith.muli %arg0, %c1_i32 : i32
    %1 = arith.addi %0, %arg1 : i32
    %c0_i32 = arith.constant 0 : i32
    %c0_i32_0 = arith.constant 0 : i32
    return %c0_i32, %1 : i32, i32
  }
  func.func @transform_1(%arg0: i32, %arg1: i32) -> (i32, i32) {
    %c0_i32 = arith.constant 0 : i32
    %c0_i32_0 = arith.constant 0 : i32
    %c0_i32_1 = arith.constant 0 : i32
    return %c0_i32, %c0_i32_0 : i32, i32
  }
  func.func @transform_2(%arg0: i32, %arg1: i32) -> (i32, i32) {
    %c0_i32 = arith.constant 0 : i32
    %c0_i32_0 = arith.constant 0 : i32
    %c0_i32_1 = arith.constant 0 : i32
    return %c0_i32, %c0_i32_0 : i32, i32
  }
  func.func @transform_3(%arg0: i32, %arg1: i32) -> (i32, i32, i32) {
    %c0_i32 = arith.constant 0 : i32
    %c0_i32_0 = arith.constant 0 : i32
    %c0_i32_1 = arith.constant 0 : i32
    return %arg0, %c0_i32, %c0_i32_0 : i32, i32, i32
  }
}

</mosaic_0001>

<bundles_post_ra>
// kernel: critic_forward.1
= control target key start
LH: loop header
LB: loop body
LE: loop exit
PB: predicated region body
PF: predicated region fallthrough
CT: control target
= control target key end

     0   :  { %s579_s12 = smov 0   ;;  %s581_s13 = smov 0   ;;  %s687_s0 = inlined_call_operand.vmem [shape: bf16[10,256], index: 0, kind: input, shape index: {}]   ;;  %s688_s1 = inlined_call_operand.vmem [shape: bf16[32,10], index: 1, kind: input, shape index: {}]   ;;  %s689_s2 = inlined_call_operand.vmem [shape: f32[32,1], index: 2, kind: input, shape index: {}]   ;;  %s690_s3 = inlined_call_operand.vmem [shape: f32[2,32,1], index: 3, kind: output, shape index: {}]  }
   0x1   :  { %s583_s14 = smov 0   ;;  %s585_s15 = smov 0  }
   0x2   :  { %s587_s16 = smov 0  }
   0x3 LB: > { %s25_s17 = sadd.s32 1, %s551_s15  ;;  %p41_p1 = scmp.ne.s32.totalorder %s543_s13, %s539_s12  ;;  %s555_s16 = sphi %s587_s16, %s13_s16   ;;  %s551_s15 = sphi %s585_s15, %s694_s15   ;;  %s547_s14 = sphi %s583_s14, %s693_s14   ;;  %s543_s13 = sphi %s581_s13, %s692_s13   ;;  %s539_s12 = sphi %s579_s12, %s691_s12  }
   0x4   : > { %p27_p0 = scmp.ge.s32.totalorder %s25_s17, 2  ;;  %p42_p2 = scmp.eq.s32.totalorder %s555_s16, 0 }
   0x5   : > { %s34_s19 = sadd.s32 1, %s543_s13  ;;  %p445_p5 = scmp.ge.s32.totalorder %s555_s16, 2 }
   0x6   : > { %s696_s17 = smov (%p27_p0, %s25_s17), 0  ;;  %p43_p3 = por %p42_p2, %p41_p1 }
   0x7   : > { %s31_s18 = ssub.s32 %s551_s15, %s696_s17  ;;  %141 = sbr.rel (%p445_p5) target bundleno = 21 (0x15), region = 24 }
   0x8   : > { %p32_p4 = scmp.eq.s32.totalorder %s31_s18, 0 }
   0xa   : > { %s614_s20 = scalar_select %p32_p4, %s543_s13, %s34_s19  }
   0xe   : > { %144 = sbr.rel (!%p43_p3) target bundleno = 21 (0x15), region = 28  ;;  %s146_s21 = sand.u32 (%p43_p3), 1, %s543_s13  }
   0xf   : > { %s447_s22 = sshll.u32 (%p43_p3), %s551_s15, 2  ;;  %s446_s23 = sshll.u32 (%p43_p3), %s146_s21, 3 }
  0x10   : > { %s151_s26 = scalar_lea.vmem (%p43_p3), %s687_s0, %s447_s22  ;;  %s148_s27 = scalar_lea.vmem (%p43_p3), [#allocation2], %s446_s23 }
  0x11   : > { %v167_v0 = vld [vmem:[%s151_s26] sm:$0xf] (%p43_p3)  ;;  %v169_v1 = vld [vmem:[%s151_s26 + $0x8] sm:$0xf] (%p43_p3) }
  0x12   : > { %168 = vst [vmem:[%s148_s27] sm:$0xf] (%p43_p3), %v167_v0  ;;  %170 = vst [vmem:[%s148_s27 + $0x4] sm:$0xf] (%p43_p3), %v169_v1 }
  0x15 PF: > { %p448_p6 = scmp.ge.s32.totalorder %s555_s16, 1  ;;  %p196_p7 = scmp.lt.s32.totalorder %s555_s16, 3 }
  0x17   : > { %p197_p8 = pnand %p448_p6, %p196_p7 }
  0x18   : > { %s203_s28 = sand.u32 (!%p197_p8), 1, %s539_s12   ;;  %vm294_vm0 = vcmask (!%p197_p8), 1044480   ;;  %v515_v2 = vld [vmem:[%s688_s1] sm:$0xff] (!%p197_p8)   ;;  %vm287_vm1 = vcmask (!%p197_p8), 80896   ;;  %v250_v4 = vld [vmem:[%s689_s2 + $0x10] sm:$0xff] (!%p197_p8)  ;;  %v557_v6 = vmov (!%p197_p8), 0  }
  0x19   : > { %200 = sbr.rel (%p197_p8) target bundleno = 402 (0x192), region = 69  ;;  %s449_s29 = sshll.u32 (!%p197_p8), %s203_s28, 3  ;;  %v248_v3 = vld [vmem:[%s689_s2] sm:$0xff] (!%p197_p8)  ;;  %465 = vmatprep.mubr.msk.bf16.mxu0 (!%p197_p8), %vm287_vm1, %v515_v2  ;;  %512 = vset.pattern.permute.xlu0 (!%p197_p8), %v557_v6  ;;  %v516_v8 = vld [vmem:[%s688_s1 + $0x8] sm:$0xff] (!%p197_p8)   ;;  %v251_v10 = vld [vmem:[%s689_s2 + $0x18] sm:$0xff] (!%p197_p8)  ;;  %vm237_vm2 = vcmask (!%p197_p8), 7168  }
  0x1a   : > { %s205_s9 = scalar_lea.vmem (!%p197_p8), [#allocation2], %s449_s29  ;;  %513 = vset.pattern.permute.xlu1 (!%p197_p8), %v557_v6  ;;  %254 = vperm.xlu0 (!%p197_p8), %512, %v248_v3   ;;  %v249_v9 = vld [vmem:[%s689_s2 + $0x8] sm:$0xff] (!%p197_p8)  ;;  %p227_p9 = scmp.lt.s32.totalorder (!%p197_p8), %s547_s14, 1  ;;  %v558_v11 = vmov (!%p197_p8), 0.0  }
  0x1b   : > { %v514_v5 = vld [vmem:[%s205_s9] sm:$0x1f] (!%p197_p8)   ;;  %264 = vperm.xlu1 (!%p197_p8), %513, %v250_v4  }
  0x1c   : > { %469 = vmatprep.subr.msk.bf16.mxu0 (!%p197_p8), %vm294_vm0, %v514_v5  ;;  %v296_v7 = vsel (!%p197_p8), %vm294_vm0, %v514_v5, 0 }
  0x1d   : > { %464 = vmatpush3.bf16.msra.mxu0 (!%p197_p8), %v296_v7 }
  0x1e   : > { %259 = vperm.xlu0 (!%p197_p8), %512, %v249_v9  }
  0x1f   : > { %269 = vperm.xlu1 (!%p197_p8), %513, %v251_v10  }
  0x20   : > { %466 = vmatmul.mubr.msk.bf16.vlgmr.msra.gmra.mrb[0].mxu0 %vm287_vm1, %v516_v8  ;;  %s698_s14 = smov (!%p227_p9, %s547_s14), 1 }
  0x21   : > { %s459_s22 = sshll.u32 %s698_s14, 5 }
  0x22   : > { %s650_s25 = scalar_lea.vmem %s690_s3, %s459_s22 }
  0x23   : > { %238 = vst.msk [vmem:[%s650_s25] sm:$0xff] %vm237_vm2, %v558_v11  ;;  %239 = vst.msk [vmem:[%s650_s25 + $0x8] sm:$0xff] %vm237_vm2, %v558_v11 }
  0x24   : > { %240 = vst.msk [vmem:[%s650_s25 + $0x10] sm:$0xff] %vm237_vm2, %v558_v11  ;;  %241 = vst.msk [vmem:[%s650_s25 + $0x18] sm:$0xff] %vm237_vm2, %v558_v11 }
  0x2a   : > { %v351_v28 = vld [vmem:[%s650_s25] sm:$0xff]  ;;  %v352_v30 = vld [vmem:[%s650_s25 + $0x8] sm:$0xff] }
  0x2b   : > { %v353_v33 = vld [vmem:[%s650_s25 + $0x10] sm:$0xff]  ;;  %v354_v37 = vld [vmem:[%s650_s25 + $0x18] sm:$0xff] }
  0x99   : > { %v255_v12 = vpop.permute.xlu0 %254 }
  0x9a   : > { %v265_v13 = vpop.permute.xlu1 %264 }
  0x9d   : > { %v260_v18 = vpop.permute.xlu0 %259 }
  0x9e   : > { %v270_v23 = vpop.permute.xlu1 %269 }
  0xf3   : > { %v467_v14 = vpop.f32.mrb[0].mxu0 }
  0xf4   : > { %v332_v15 = vpop.f32.mrb[1].mxu0  ;;  %v341_v20 = vadd.f32 %v467_v14, %v265_v13 }
  0xf5   : > { %v333_v16 = vadd.f32 %v332_v15, %v255_v12  ;;  %v468_v17 = vpop.f32.mrb[2].mxu0 }
  0xf6   : > { %v335_v19 = vpop.f32.mrb[3].mxu0  ;;  %v349_v25 = vmax.f32 %v341_v20, 0.0  ;;  %v344_v26 = vadd.f32 %v468_v17, %v270_v23 }
  0xf7   : > { %v347_v21 = vmax.f32 %v333_v16, 0.0  ;;  %v336_v22 = vadd.f32 %v335_v19, %v260_v18 }
  0xf8   : > { %v350_v27 = vmax.f32 %v344_v26, 0.0 }
  0xf9   : > { %v348_v24 = vmax.f32 %v336_v22, 0.0  ;;  %355 = vadd.xlane.f32.xlu0 %v347_v21 }
  0xfb   : > { %357 = vadd.xlane.f32.xlu1 %v348_v24 }
  0xfd   : > { %359 = vadd.xlane.f32.xlu0 %v349_v25 }
 0x101   : > { %361 = vadd.xlane.f32.xlu0 %v350_v27 }
 0x186   : > { %v356_v29 = vpop.xlane.xlu0 %355 }
 0x187   : > { %v363_v31 = vadd.f32 %v356_v29, %v351_v28 }
 0x188   : > { %v358_v32 = vpop.xlane.xlu1 %357 }
 0x189   : > { %368 = vst.msk [vmem:[%s650_s25] sm:$0xff] %vm237_vm2, %v363_v31  ;;  %v364_v34 = vadd.f32 %v358_v32, %v352_v30 }
 0x18a   : > { %v360_v35 = vpop.xlane.xlu0 %359 }
 0x18b   : > { %369 = vst.msk [vmem:[%s650_s25 + $0x8] sm:$0xff] %vm237_vm2, %v364_v34  ;;  %v365_v36 = vadd.f32 %v360_v35, %v353_v33 }
 0x18d   : > { %370 = vst.msk [vmem:[%s650_s25 + $0x10] sm:$0xff] %vm237_vm2, %v365_v36 }
 0x18e   : > { %v362_v38 = vpop.xlane.xlu0 %361 }
 0x18f   : > { %v366_v39 = vadd.f32 %v362_v38, %v354_v37 }
 0x191   : > { %371 = vst.msk [vmem:[%s650_s25 + $0x18] sm:$0xff] %vm237_vm2, %v366_v39 }
 0x192 PF: > { %s13_s16 = sadd.s32 1, %s555_s16   ;;  %s691_s12 = smov %s543_s13 }
 0x193   : > { %p10_p10 = scmp.ge.s32.totalorder %s13_s16, 4   ;;  %s692_s13 = smov %s614_s20 }
 0x194   : > { %s693_s14 = smov %s551_s15  ;;  %s694_s15 = smov %s696_s17 }
 0x195   :  { %12 = sbr.rel (!%p10_p10) target bundleno = 3 (0x3), region = 112 }

</bundles_post_ra>
